<compile_context>
chip_gen: v7x
topology: tpu7x:2x2x1
jax: 0.10.0
libtpu: 0.0.40
codegen_flags: <defaults>
</compile_context>

<pallas_src>
import functools

import jax
import jax.numpy as jnp
from jax.experimental import pallas as pl
from jax.experimental.pallas import tpu as pltpu


def _spatial_attention_kernel(w_ref, edge_ref, x_ref, o_ref, sum_ref, max_ref,
                              *, H, W):
    # w_ref   : SMEM f32[18]      flattened (1,2,3,3) weights, avg weights pre-scaled by 1/C
    # edge_ref: VMEM f32[2, H*W]  row 0: 1.0 where x>0, row 1: 1.0 where x<W-1
    # x_ref   : VMEM   [bt, ct, H*W] input block (channels chunk)
    # o_ref   : VMEM   [bt, H*W]  output block (lane-dense)
    # sum_ref : VMEM f32[bt, H*W] running channel sum  (scratch)
    # max_ref : VMEM f32[bt, H*W] running channel max  (scratch)
    HW = H * W
    c_idx = pl.program_id(1)
    n_chunks = pl.num_programs(1)

    @pl.when(c_idx == 0)
    def _init():
        sum_ref[...] = jnp.zeros_like(sum_ref)
        max_ref[...] = jnp.full_like(max_ref, -jnp.inf)

    x = x_ref[...].astype(jnp.float32)                    # (bt, ct, HW)
    sum_ref[...] = sum_ref[...] + jnp.sum(x, axis=1)      # (bt, HW)
    max_ref[...] = jnp.maximum(max_ref[...], jnp.max(x, axis=1))

    @pl.when(c_idx == n_chunks - 1)
    def _finalize():
        s = sum_ref[...]     # raw channel sum; 1/C already folded into weights
        m = max_ref[...]
        bt = s.shape[0]

        # Flat zero padding of W+1 on both sides: any vertical (dy=+-1) tap
        # that falls outside the image lands in these zeros, so no top/bottom
        # masks are needed.  Horizontal (dx=+-1) taps that cross a row boundary
        # are zeroed by the precomputed left/right edge masks below.
        zpad = jnp.zeros((bt, W + 1), jnp.float32)
        feats = (jnp.concatenate([zpad, s, zpad], axis=1),   # conv in-ch 0: avg
                 jnp.concatenate([zpad, m, zpad], axis=1))   # conv in-ch 1: max

        acc_c = jnp.zeros((bt, HW), jnp.float32)   # dx ==  0 taps
        acc_l = jnp.zeros((bt, HW), jnp.float32)   # dx == -1 taps
        acc_r = jnp.zeros((bt, HW), jnp.float32)   # dx == +1 taps
        for ch in range(2):
            pf = feats[ch]
            for ky in range(3):
                for kx in range(3):
                    wv = w_ref[ch * 9 + ky * 3 + kx]            # SMEM scalar
                    start = (W + 1) + (ky - 1) * W + (kx - 1)   # static offset
                    term = wv * pf[:, start:start + HW]
                    if kx == 0:
                        acc_l = acc_l + term
                    elif kx == 2:
                        acc_r = acc_r + term
                    else:
                        acc_c = acc_c + term

        left_ok = edge_ref[0:1, :]      # (1, HW) -> broadcast over bt
        right_ok = edge_ref[1:2, :]
        conv = acc_c + left_ok * acc_l + right_ok * acc_r
        o_ref[...] = jax.nn.sigmoid(conv).astype(o_ref.dtype)


def _pick_tiles(N, C, HW, itemsize, budget_bytes=2 << 20):
    """Pick (batch tile, channel tile) so each input block is <= ~2 MiB."""
    # Batch tile: output block is (bt, HW) and its second-to-last dim must be a
    # multiple of 8 or cover the full batch (TPU (8,128) block rule).
    cands = [d for d in range(1, N + 1) if N % d == 0 and (d == N or d % 8 == 0)]
    per_img = C * HW * itemsize
    best = None
    for d in sorted(cands, reverse=True):
        # Prefer >= 2 grid steps when possible (v7x has 2 TensorCores).
        if N // d >= 2 and d * per_img <= budget_bytes:
            best = d
            break
    if best is None:
        fitting = [d for d in cands if d * per_img <= budget_bytes]
        best = min(fitting) if fitting else min(cands)
    bt = best

    # Channel tile: second-to-last dim of the input block -> multiple of 8 or
    # the full channel count.
    ct = C
    if bt * C * HW * itemsize > budget_bytes:
        ct_cands = [d for d in range(8, C + 1, 8)
                    if C % d == 0 and bt * d * HW * itemsize <= budget_bytes]
        if ct_cands:
            ct = max(ct_cands)
        # else: fall back to the full channel dim and rely on vmem_limit_bytes.
    return bt, ct


def spatial_attention(x, weight):
    """x: (N, C, H, W), weight: (1, 2, 3, 3) f32  ->  (N, 1, H, W)."""
    N, C, H, W = x.shape
    HW = H * W

    # Lane-dense presentation of the input (free metadata reshape, no pad).
    xf = x.reshape(N, C, HW)

    # Fold 1/C into the avg-channel weights so the kernel only needs the sum.
    scale = jnp.array([1.0 / C, 1.0], dtype=jnp.float32).reshape(1, 2, 1, 1)
    w_flat = (weight.astype(jnp.float32) * scale).reshape(-1)        # (18,)

    # Precomputed horizontal edge masks (valid-left, valid-right) per flat pixel.
    col = jnp.arange(HW, dtype=jnp.int32) % W
    edge = jnp.stack([(col >= 1), (col <= W - 2)]).astype(jnp.float32)  # (2, HW)

    bt, ct = _pick_tiles(N, C, HW, x.dtype.itemsize)
    grid = (N // bt, C // ct)

    kernel = functools.partial(_spatial_attention_kernel, H=H, W=W)
    out = pl.pallas_call(
        kernel,
        out_shape=jax.ShapeDtypeStruct((N, HW), x.dtype),
        grid_spec=pltpu.PrefetchScalarGridSpec(
            num_scalar_prefetch=0,
            grid=grid,
            in_specs=[
                pl.BlockSpec(memory_space=pltpu.MemorySpace.SMEM),   # weights
                pl.BlockSpec((2, HW), lambda n, c: (0, 0)),          # edge masks
                pl.BlockSpec((bt, ct, HW), lambda n, c: (n, c, 0)),  # input
            ],
            out_specs=pl.BlockSpec((bt, HW), lambda n, c: (n, 0)),
            scratch_shapes=[
                pltpu.VMEM((bt, HW), jnp.float32),   # running channel sum
                pltpu.VMEM((bt, HW), jnp.float32),   # running channel max
            ],
        ),
        compiler_params=pltpu.CompilerParams(
            dimension_semantics=("parallel", "arbitrary"),
            vmem_limit_bytes=32 * 1024 * 1024,
        ),
    )(w_flat, edge, xf)

    return out.reshape(N, 1, H, W)


def _reference(x, weight):
    avg = jnp.mean(x, axis=1, keepdims=True)
    mx = jnp.max(x, axis=1, keepdims=True)
    feat = jnp.concatenate([avg, mx], axis=1)
    conv = jax.lax.conv_general_dilated(
        feat, weight, window_strides=(1, 1), padding=((1, 1), (1, 1)),
        dimension_numbers=("NCHW", "OIHW", "NCHW"))
    return jax.nn.sigmoid(conv)


if __name__ == "__main__":
    key = jax.random.PRNGKey(0)
    kx, kw = jax.random.split(key)

    N, C, H, W = 2, 4, 16, 16
    x = jax.random.normal(kx, (N, C, H, W), dtype=jnp.float32)

    # Deterministic init mimicking PyTorch Conv2d default (U[-1/sqrt(fan_in), +]).
    fan_in = 2 * 3 * 3
    bound = 1.0 / (fan_in ** 0.5)
    weight = jax.random.uniform(kw, (1, 2, 3, 3), dtype=jnp.float32,
                                minval=-bound, maxval=bound)

    out = spatial_attention(x, weight)
    out = jax.block_until_ready(out)

    ref = _reference(x, weight)
    assert out.shape == (N, 1, H, W)
    assert jnp.allclose(out, ref, atol=1e-5, rtol=1e-5), "mismatch vs reference"

    print("KERNEL_OK")
</pallas_src>

<mosaic_0001>
module attributes {stable_mosaic.version = 11 : i64} {
  func.func @_spatial_attention_kernel(%arg0: i32, %arg1: i32, %arg2: memref<18xf32, #tpu.memory_space<smem>>, %arg3: memref<2x256xf32, #tpu.memory_space<vmem>>, %arg4: memref<2x4x256xf32, #tpu.memory_space<vmem>>, %arg5: memref<2x256xf32, #tpu.memory_space<vmem>>, %arg6: memref<2x256xf32, #tpu.memory_space<vmem>>, %arg7: memref<2x256xf32, #tpu.memory_space<vmem>>) attributes {dimension_semantics = [#tpu.dimension_semantics<parallel>, #tpu.dimension_semantics<arbitrary>], iteration_bounds = array<i64: 1, 1>, scalar_prefetch = 0 : i64, scratch_operands = 2 : i64, tpu.core_type = #tpu.core_type<tc>, window_params = [{transform_indices = @transform_0, window_bounds = array<i64: 18>}, {pipeline_mode = #tpu.pipeline_mode<synchronous>, transform_indices = @transform_1, window_bounds = array<i64: 2, 256>}, {transform_indices = @transform_2, window_bounds = array<i64: 2, 4, 256>}, {transform_indices = @transform_3, window_bounds = array<i64: 2, 256>}]} {
    %c0_i32 = arith.constant 0 : i32
    %0 = arith.cmpi eq, %arg1, %c0_i32 : i32
    %1 = arith.extui %0 : i1 to i32
    %c0_i32_0 = arith.constant 0 : i32
    %2 = arith.cmpi ne, %1, %c0_i32_0 : i32
    scf.if %2 {
      %cst_14 = arith.constant 0.000000e+00 : f32
      %15 = vector.broadcast %cst_14 : f32 to vector<2x256xf32>
      %c0_15 = arith.constant 0 : index
      %c0_16 = arith.constant 0 : index
      %16 = vector.load %arg6[%c0_15, %c0_16] : memref<2x256xf32, #tpu.memory_space<vmem>>, vector<2x256xf32>
      tpu.vector_store %arg6[%c0_15, %c0_16], %15 {strides = array<i32>} : memref<2x256xf32, #tpu.memory_space<vmem>>, vector<2x256xf32>,
      %cst_17 = arith.constant 0xFF800000 : f32
      %17 = vector.broadcast %cst_17 : f32 to vector<2x256xf32>
      %c0_18 = arith.constant 0 : index
      %c0_19 = arith.constant 0 : index
      %18 = vector.load %arg7[%c0_18, %c0_19] : memref<2x256xf32, #tpu.memory_space<vmem>>, vector<2x256xf32>
      tpu.vector_store %arg7[%c0_18, %c0_19], %17 {strides = array<i32>} : memref<2x256xf32, #tpu.memory_space<vmem>>, vector<2x256xf32>,
    } else {
    }
    %c0 = arith.constant 0 : index
    %c0_1 = arith.constant 0 : index
    %c0_2 = arith.constant 0 : index
    %3 = vector.load %arg4[%c0, %c0_1, %c0_2] : memref<2x4x256xf32, #tpu.memory_space<vmem>>, vector<2x4x256xf32>
    %c0_3 = arith.constant 0 : index
    %c0_4 = arith.constant 0 : index
    %4 = vector.load %arg6[%c0_3, %c0_4] : memref<2x256xf32, #tpu.memory_space<vmem>>, vector<2x256xf32>
    %cst = arith.constant dense<0.000000e+00> : vector<2x256xf32>
    %5 = vector.multi_reduction <add>, %3, %cst [1] : vector<2x4x256xf32> to vector<2x256xf32>
    %6 = arith.addf %4, %5 : vector<2x256xf32>
    %c0_5 = arith.constant 0 : index
    %c0_6 = arith.constant 0 : index
    %7 = vector.load %arg6[%c0_5, %c0_6] : memref<2x256xf32, #tpu.memory_space<vmem>>, vector<2x256xf32>
    tpu.vector_store %arg6[%c0_5, %c0_6], %6 {strides = array<i32>} : memref<2x256xf32, #tpu.memory_space<vmem>>, vector<2x256xf32>,
    %c0_7 = arith.constant 0 : index
    %c0_8 = arith.constant 0 : index
    %8 = vector.load %arg7[%c0_7, %c0_8] : memref<2x256xf32, #tpu.memory_space<vmem>>, vector<2x256xf32>
    %cst_9 = arith.constant dense<0xFF800000> : vector<2x256xf32>
    %9 = vector.multi_reduction <maximumf>, %3, %cst_9 [1] : vector<2x4x256xf32> to vector<2x256xf32>
    %10 = arith.maximumf %8, %9 : vector<2x256xf32>
    %c0_10 = arith.constant 0 : index
    %c0_11 = arith.constant 0 : index
    %11 = vector.load %arg7[%c0_10, %c0_11] : memref<2x256xf32, #tpu.memory_space<vmem>>, vector<2x256xf32>
    tpu.vector_store %arg7[%c0_10, %c0_11], %10 {strides = array<i32>} : memref<2x256xf32, #tpu.memory_space<vmem>>, vector<2x256xf32>,
    %c0_i32_12 = arith.constant 0 : i32
    %12 = arith.cmpi eq, %arg1, %c0_i32_12 : i32
    %13 = arith.extui %12 : i1 to i32
    %c0_i32_13 = arith.constant 0 : i32
    %14 = arith.cmpi ne, %13, %c0_i32_13 : i32
    scf.if %14 {
      %c0_14 = arith.constant 0 : index
      %c0_15 = arith.constant 0 : index
      %15 = vector.load %arg6[%c0_14, %c0_15] : memref<2x256xf32, #tpu.memory_space<vmem>>, vector<2x256xf32>
      %c0_16 = arith.constant 0 : index
      %c0_17 = arith.constant 0 : index
      %16 = vector.load %arg7[%c0_16, %c0_17] : memref<2x256xf32, #tpu.memory_space<vmem>>, vector<2x256xf32>
      %cst_18 = arith.constant 0.000000e+00 : f32
      %17 = vector.broadcast %cst_18 : f32 to vector<2x17xf32>
      %18 = tpu.concatenate %17, %15, %17 in 1 : vector<2x17xf32>, vector<2x256xf32>, vector<2x17xf32> -> vector<2x290xf32>
      %19 = tpu.concatenate %17, %16, %17 in 1 : vector<2x17xf32>, vector<2x256xf32>, vector<2x17xf32> -> vector<2x290xf32>
      %cst_19 = arith.constant 0.000000e+00 : f32
      %20 = vector.broadcast %cst_19 : f32 to vector<2x256xf32>
      %cst_20 = arith.constant 0.000000e+00 : f32
      %21 = vector.broadcast %cst_20 : f32 to vector<2x256xf32>
      %cst_21 = arith.constant 0.000000e+00 : f32
      %22 = vector.broadcast %cst_21 : f32 to vector<2x256xf32>
      %c0_22 = arith.constant 0 : index
      %23 = memref.load %arg2[%c0_22] : memref<18xf32, #tpu.memory_space<smem>>
      %24 = vector.extract_strided_slice %18 {offsets = [0, 0], sizes = [2, 256], strides = [1, 1]} : vector<2x290xf32> to vector<2x256xf32>
      %25 = vector.broadcast %23 : f32 to vector<2x256xf32>
      %26 = arith.mulf %25, %24 : vector<2x256xf32>
      %27 = arith.addf %21, %26 : vector<2x256xf32>
      %c1 = arith.constant 1 : index
      %28 = memref.load %arg2[%c1] : memref<18xf32, #tpu.memory_space<smem>>
      %29 = vector.extract_strided_slice %18 {offsets = [0, 1], sizes = [2, 256], strides = [1, 1]} : vector<2x290xf32> to vector<2x256xf32>
      %30 = vector.broadcast %28 : f32 to vector<2x256xf32>
      %31 = arith.mulf %30, %29 : vector<2x256xf32>
      %32 = arith.addf %20, %31 : vector<2x256xf32>
      %c2 = arith.constant 2 : index
      %33 = memref.load %arg2[%c2] : memref<18xf32, #tpu.memory_space<smem>>
      %34 = vector.extract_strided_slice %18 {offsets = [0, 2], sizes = [2, 256], strides = [1, 1]} : vector<2x290xf32> to vector<2x256xf32>
      %35 = vector.broadcast %33 : f32 to vector<2x256xf32>
      %36 = arith.mulf %35, %34 : vector<2x256xf32>
      %37 = arith.addf %22, %36 : vector<2x256xf32>
      %c3 = arith.constant 3 : index
      %38 = memref.load %arg2[%c3] : memref<18xf32, #tpu.memory_space<smem>>
      %39 = vector.extract_strided_slice %18 {offsets = [0, 16], sizes = [2, 256], strides = [1, 1]} : vector<2x290xf32> to vector<2x256xf32>
      %40 = vector.broadcast %38 : f32 to vector<2x256xf32>
      %41 = arith.mulf %40, %39 : vector<2x256xf32>
      %42 = arith.addf %27, %41 : vector<2x256xf32>
      %c4 = arith.constant 4 : index
      %43 = memref.load %arg2[%c4] : memref<18xf32, #tpu.memory_space<smem>>
      %44 = vector.extract_strided_slice %18 {offsets = [0, 17], sizes = [2, 256], strides = [1, 1]} : vector<2x290xf32> to vector<2x256xf32>
      %45 = vector.broadcast %43 : f32 to vector<2x256xf32>
      %46 = arith.mulf %45, %44 : vector<2x256xf32>
      %47 = arith.addf %32, %46 : vector<2x256xf32>
      %c5 = arith.constant 5 : index
      %48 = memref.load %arg2[%c5] : memref<18xf32, #tpu.memory_space<smem>>
      %49 = vector.extract_strided_slice %18 {offsets = [0, 18], sizes = [2, 256], strides = [1, 1]} : vector<2x290xf32> to vector<2x256xf32>
      %50 = vector.broadcast %48 : f32 to vector<2x256xf32>
      %51 = arith.mulf %50, %49 : vector<2x256xf32>
      %52 = arith.addf %37, %51 : vector<2x256xf32>
      %c6 = arith.constant 6 : index
      %53 = memref.load %arg2[%c6] : memref<18xf32, #tpu.memory_space<smem>>
      %54 = vector.extract_strided_slice %18 {offsets = [0, 32], sizes = [2, 256], strides = [1, 1]} : vector<2x290xf32> to vector<2x256xf32>
      %55 = vector.broadcast %53 : f32 to vector<2x256xf32>
      %56 = arith.mulf %55, %54 : vector<2x256xf32>
      %57 = arith.addf %42, %56 : vector<2x256xf32>
      %c7 = arith.constant 7 : index
      %58 = memref.load %arg2[%c7] : memref<18xf32, #tpu.memory_space<smem>>
      %59 = vector.extract_strided_slice %18 {offsets = [0, 33], sizes = [2, 256], strides = [1, 1]} : vector<2x290xf32> to vector<2x256xf32>
      %60 = vector.broadcast %58 : f32 to vector<2x256xf32>
      %61 = arith.mulf %60, %59 : vector<2x256xf32>
      %62 = arith.addf %47, %61 : vector<2x256xf32>
      %c8 = arith.constant 8 : index
      %63 = memref.load %arg2[%c8] : memref<18xf32, #tpu.memory_space<smem>>
      %64 = vector.extract_strided_slice %18 {offsets = [0, 34], sizes = [2, 256], strides = [1, 1]} : vector<2x290xf32> to vector<2x256xf32>
      %65 = vector.broadcast %63 : f32 to vector<2x256xf32>
      %66 = arith.mulf %65, %64 : vector<2x256xf32>
      %67 = arith.addf %52, %66 : vector<2x256xf32>
      %c9 = arith.constant 9 : index
      %68 = memref.load %arg2[%c9] : memref<18xf32, #tpu.memory_space<smem>>
      %69 = vector.extract_strided_slice %19 {offsets = [0, 0], sizes = [2, 256], strides = [1, 1]} : vector<2x290xf32> to vector<2x256xf32>
      %70 = vector.broadcast %68 : f32 to vector<2x256xf32>
      %71 = arith.mulf %70, %69 : vector<2x256xf32>
      %72 = arith.addf %57, %71 : vector<2x256xf32>
      %c10 = arith.constant 10 : index
      %73 = memref.load %arg2[%c10] : memref<18xf32, #tpu.memory_space<smem>>
      %74 = vector.extract_strided_slice %19 {offsets = [0, 1], sizes = [2, 256], strides = [1, 1]} : vector<2x290xf32> to vector<2x256xf32>
      %75 = vector.broadcast %73 : f32 to vector<2x256xf32>
      %76 = arith.mulf %75, %74 : vector<2x256xf32>
      %77 = arith.addf %62, %76 : vector<2x256xf32>
      %c11 = arith.constant 11 : index
      %78 = memref.load %arg2[%c11] : memref<18xf32, #tpu.memory_space<smem>>
      %79 = vector.extract_strided_slice %19 {offsets = [0, 2], sizes = [2, 256], strides = [1, 1]} : vector<2x290xf32> to vector<2x256xf32>
      %80 = vector.broadcast %78 : f32 to vector<2x256xf32>
      %81 = arith.mulf %80, %79 : vector<2x256xf32>
      %82 = arith.addf %67, %81 : vector<2x256xf32>
      %c12 = arith.constant 12 : index
      %83 = memref.load %arg2[%c12] : memref<18xf32, #tpu.memory_space<smem>>
      %84 = vector.extract_strided_slice %19 {offsets = [0, 16], sizes = [2, 256], strides = [1, 1]} : vector<2x290xf32> to vector<2x256xf32>
      %85 = vector.broadcast %83 : f32 to vector<2x256xf32>
      %86 = arith.mulf %85, %84 : vector<2x256xf32>
      %87 = arith.addf %72, %86 : vector<2x256xf32>
      %c13 = arith.constant 13 : index
      %88 = memref.load %arg2[%c13] : memref<18xf32, #tpu.memory_space<smem>>
      %89 = vector.extract_strided_slice %19 {offsets = [0, 17], sizes = [2, 256], strides = [1, 1]} : vector<2x290xf32> to vector<2x256xf32>
      %90 = vector.broadcast %88 : f32 to vector<2x256xf32>
      %91 = arith.mulf %90, %89 : vector<2x256xf32>
      %92 = arith.addf %77, %91 : vector<2x256xf32>
      %c14 = arith.constant 14 : index
      %93 = memref.load %arg2[%c14] : memref<18xf32, #tpu.memory_space<smem>>
      %94 = vector.extract_strided_slice %19 {offsets = [0, 18], sizes = [2, 256], strides = [1, 1]} : vector<2x290xf32> to vector<2x256xf32>
      %95 = vector.broadcast %93 : f32 to vector<2x256xf32>
      %96 = arith.mulf %95, %94 : vector<2x256xf32>
      %97 = arith.addf %82, %96 : vector<2x256xf32>
      %c15 = arith.constant 15 : index
      %98 = memref.load %arg2[%c15] : memref<18xf32, #tpu.memory_space<smem>>
      %99 = vector.extract_strided_slice %19 {offsets = [0, 32], sizes = [2, 256], strides = [1, 1]} : vector<2x290xf32> to vector<2x256xf32>
      %100 = vector.broadcast %98 : f32 to vector<2x256xf32>
      %101 = arith.mulf %100, %99 : vector<2x256xf32>
      %102 = arith.addf %87, %101 : vector<2x256xf32>
      %c16 = arith.constant 16 : index
      %103 = memref.load %arg2[%c16] : memref<18xf32, #tpu.memory_space<smem>>
      %104 = vector.extract_strided_slice %19 {offsets = [0, 33], sizes = [2, 256], strides = [1, 1]} : vector<2x290xf32> to vector<2x256xf32>
      %105 = vector.broadcast %103 : f32 to vector<2x256xf32>
      %106 = arith.mulf %105, %104 : vector<2x256xf32>
      %107 = arith.addf %92, %106 : vector<2x256xf32>
      %c17 = arith.constant 17 : index
      %108 = memref.load %arg2[%c17] : memref<18xf32, #tpu.memory_space<smem>>
      %109 = vector.extract_strided_slice %19 {offsets = [0, 34], sizes = [2, 256], strides = [1, 1]} : vector<2x290xf32> to vector<2x256xf32>
      %110 = vector.broadcast %108 : f32 to vector<2x256xf32>
      %111 = arith.mulf %110, %109 : vector<2x256xf32>
      %112 = arith.addf %97, %111 : vector<2x256xf32>
      %c0_23 = arith.constant 0 : index
      %c0_24 = arith.constant 0 : index
      %113 = vector.load %arg3[%c0_23, %c0_24] : memref<2x256xf32, #tpu.memory_space<vmem>>, vector<1x256xf32>
      %c1_25 = arith.constant 1 : index
      %c0_26 = arith.constant 0 : index
      %114 = vector.load %arg3[%c1_25, %c0_26] : memref<2x256xf32, #tpu.memory_space<vmem>>, vector<1x256xf32>
      %115 = vector.broadcast %113 : vector<1x256xf32> to vector<2x256xf32>
      %116 = arith.mulf %115, %102 : vector<2x256xf32>
      %117 = arith.addf %107, %116 : vector<2x256xf32>
      %118 = vector.broadcast %114 : vector<1x256xf32> to vector<2x256xf32>
      %119 = arith.mulf %118, %112 : vector<2x256xf32>
      %120 = arith.addf %117, %119 : vector<2x256xf32>
      %121 = arith.negf %120 : vector<2x256xf32>
      %122 = math.exp %121 : vector<2x256xf32>
      %cst_27 = arith.constant 1.000000e+00 : f32
      %123 = vector.broadcast %cst_27 : f32 to vector<2x256xf32>
      %124 = arith.addf %123, %122 : vector<2x256xf32>
      %125 = arith.divf %123, %124 : vector<2x256xf32>
      %c0_28 = arith.constant 0 : index
      %c0_29 = arith.constant 0 : index
      %126 = vector.load %arg5[%c0_28, %c0_29] : memref<2x256xf32, #tpu.memory_space<vmem>>, vector<2x256xf32>
      tpu.vector_store %arg5[%c0_28, %c0_29], %125 {strides = array<i32>} : memref<2x256xf32, #tpu.memory_space<vmem>>, vector<2x256xf32>,
    } else {
    }
    return
  }
  func.func @transform_0(%arg0: i32, %arg1: i32) -> i32 {
    %c0_i32 = arith.constant 0 : i32
    %c0_i32_0 = arith.constant 0 : i32
    return %c0_i32 : i32
  }
  func.func @transform_1(%arg0: i32, %arg1: i32) -> (i32, i32) {
    %c0_i32 = arith.constant 0 : i32
    %c0_i32_0 = arith.constant 0 : i32
    %c0_i32_1 = arith.constant 0 : i32
    return %c0_i32, %c0_i32_0 : i32, i32
  }
  func.func @transform_2(%arg0: i32, %arg1: i32) -> (i32, i32, i32) {
    %c0_i32 = arith.constant 0 : i32
    %c0_i32_0 = arith.constant 0 : i32
    return %arg0, %arg1, %c0_i32 : i32, i32, i32
  }
  func.func @transform_3(%arg0: i32, %arg1: i32) -> (i32, i32) {
    %c0_i32 = arith.constant 0 : i32
    %c0_i32_0 = arith.constant 0 : i32
    return %arg0, %c0_i32 : i32, i32
  }
}

</mosaic_0001>

<bundles_post_ra>
// kernel: tpu_custom_call.1
= control target key start
LH: loop header
LB: loop body
LE: loop exit
PB: predicated region body
PF: predicated region fallthrough
CT: control target
= control target key end

     0   :  { %8 = vsyncpa [#allocation7], 0  ;;  %s1046_s0 = inlined_call_operand.hbm [shape: f32[18], index: 0, kind: input, shape index: {}]   ;;  %s1047_s1 = inlined_call_operand.hbm [shape: f32[2,256], index: 1, kind: input, shape index: {}]   ;;  %s1048_s2 = inlined_call_operand.hbm [shape: f32[2,4,256], index: 2, kind: input, shape index: {}]   ;;  %s1049_s3 = inlined_call_operand.hbm [shape: f32[2,256], index: 3, kind: output, shape index: {}]  }
   0x1   :  { %9 = vsyncpa [#allocation5], 0 }
   0x2   :  { %10 = vsyncpa [#allocation10], 0 }
   0x3   :  { %11 = vsyncpa [#allocation6], 0  ;;  %s719_s14 = scalar_lea.hbm %s1046_s0, 16 }
   0x4   :  { %p720_p0 = scmp.ne.s32.totalorder %s1046_s0, %s719_s14  ;;  %p723_p1 = scmp.lt.u32.totalorder %s719_s14, %s1046_s0 }
   0x6   :  { %p725_p2 = pnand %p723_p1, %p720_p0 }
   0x8   :  { %728 = shalt.err (!%p725_p2)
}
   0x9   :  { %s803_s19 = smov [#allocation4]   ;;  %s804_s22 = smov [#allocation8]  }
   0xa   :  { %19 = dma.hbm_to_smem %s1046_s0, 16, %s803_s19, [#allocation7]  }
   0xb   :  { %s26_s23 = sshll.u32 %s804_s22, 4  ;;  %s805_s24 = smov [#allocation9]   ;;  %s27_s23 = int_to_ptr.vmem [resolvable:$true] %s26_s23 }
   0xc   :  { %s35_s25 = sshll.u32 %s805_s24, 4  ;;  %s729_s28 = scalar_lea.hbm %s1047_s1, 64  ;;  %s36_s25 = int_to_ptr.vmem [resolvable:$true] %s35_s25 }
   0xd   :  { %p730_p3 = scmp.ne.s32.totalorder %s1047_s1, %s729_s28  ;;  %p733_p4 = scmp.lt.u32.totalorder %s729_s28, %s1047_s1 }
   0xf   :  { %p735_p5 = pnand %p733_p4, %p730_p3 }
  0x11   :  { %738 = shalt.err (!%p735_p5)
}
  0x12   :  { %s739_s0 = scalar_lea.vmem %s27_s23, 64  ;;  %p744_p7 = scmp.lt.s32.totalorder %s27_s23, %s27_s23 }
  0x13   :  { %p740_p6 = scmp.ne.s32.totalorder %s27_s23, %s739_s0  ;;  %p745_p8 = scmp.lt.s32.totalorder %s739_s0, %s739_s0 }
  0x15   :  { %p746_p9 = por %p745_p8, %p744_p7 }
  0x17   :  { %p747_p10 = pnand %p746_p9, %p740_p6 }
  0x19   :  { %750 = shalt.err (!%p747_p10)
}
  0x1a   :  { %29 = dma.hbm_to_vmem [thread:$0]  %s1047_s1, 64, %s27_s23, [#allocation5]  }
  0x1b   :  { %s751_s10 = scalar_lea.hbm %s1048_s2, 256 }
  0x1c   :  { %p752_p11 = scmp.ne.s32.totalorder %s1048_s2, %s751_s10  ;;  %p755_p12 = scmp.lt.u32.totalorder %s751_s10, %s1048_s2 }
  0x1e   :  { %p757_p13 = pnand %p755_p12, %p752_p11 }
  0x20   :  { %760 = shalt.err (!%p757_p13)
}
  0x21   :  { %s761_s15 = scalar_lea.vmem %s36_s25, 256  ;;  %p766_p1 = scmp.lt.s32.totalorder %s36_s25, %s36_s25 }
  0x22   :  { %p762_p0 = scmp.ne.s32.totalorder %s36_s25, %s761_s15  ;;  %p767_p2 = scmp.lt.s32.totalorder %s761_s15, %s761_s15 }
  0x24   :  { %p768_p3 = por %p767_p2, %p766_p1 }
  0x26   :  { %p769_p4 = pnand %p768_p3, %p762_p0 }
  0x28   :  { %772 = shalt.err (!%p769_p4)
}
  0x29   :  { %s806_s1 = smov 128   ;;  %s807_s16 = smov 8  }
  0x2a   :  { %41 = dma.hbm_to_vmem [thread:$0]  %s1048_s2, 256, %s36_s25, [#allocation10], %s806_s1, %s806_s1, %s807_s16  }
  0x2b   :  { %795 = dma.done.wait [#allocation7], 16  }
  0x2c   :  { %796 = vsyncadd [#allocation7], 4294967280 }
  0x2d   :  { %797 = dma.done.wait [#allocation5], 64  }
  0x2e   :  { %798 = vsyncadd [#allocation5], 4294967232 }
  0x2f   :  { %799 = dma.done.wait [#allocation10], 256  }
  0x30   :  { %800 = vsyncadd [#allocation10], 4294967040 }
  0x31   :  { %51 = sfence }
  0x32   :  { %v58_v0 = vld [vmem:[#allocation9] sm:$0xff]  ;;  %v59_v1 = vld [vmem:[#allocation9 + $0x8] sm:$0xff]  ;;  %vm67_vm0 = vcmask 1043456   ;;  %v104_v2 = vlaneseq  ;;  %v808_v3 = vmov -inf   ;;  %v809_v6 = vmov 1983009808  }
  0x33   :  { %57 = vst [vmem:[#allocation3] sm:$0xf] %v808_v3  ;;  %v63_v4 = vcombine.high %v58_v0, %v58_v0  ;;  %v64_v5 = vcombine.high %v59_v1, %v59_v1  ;;  %v102_v7 = vunpack.c.l.s4 %v809_v6  ;;  %v133_v10 = vsel %vm67_vm0, %v58_v0, -inf  ;;  %s811_s2 = smov 17   ;;  %s677_s19 = sld [smem:[#allocation4 + $0x8]] }
  0x34   :  { %v874_v8 = vshrl.u32 %v104_v2, 7  ;;  %v147_v12 = vsel %vm67_vm0, %v59_v1, -inf  ;;  %v134_v13 = vrot.slane %v133_v10, 4  ;;  %v68_v19 = vsel %vm67_vm0, %v58_v0, 0.0  ;;  %s674_s20 = sld [smem:[#allocation4 + $0x5]]  ;;  %s686_s21 = sld [smem:[#allocation4 + $0x11]] }
  0x35   :  { %v103_v9 = vunpack.c.0.s8 %v102_v7  ;;  %v140_v11 = vsel %vm67_vm0, %v63_v4, -inf  ;;  %v148_v15 = vrot.slane %v147_v12, 4  ;;  %v154_v16 = vsel %vm67_vm0, %v64_v5, -inf  ;;  %s683_s22 = sld [smem:[#allocation4 + $0xe]]  ;;  %s812_s23 = smov 96  }
  0x36   :  { %v141_v14 = vrot.slane %v140_v11, 4  ;;  %v155_v18 = vrot.slane %v154_v16, 4  ;;  %v135_v20 = vmax.f32 %v133_v10, %v134_v13  ;;  %v810_v23 = vmov 0.0   ;;  %s813_s24 = smov 112   ;;  %s672_s25 = sld [smem:[#allocation4 + $0x3]] }
  0x37   :  { %v881_v17 = vsub.s32 %v103_v9, %v874_v8  ;;  %v149_v22 = vmax.f32 %v147_v12, %v148_v15  ;;  %56 = vst [vmem:[#allocation2] sm:$0xf] %v810_v23  ;;  %v69_v24 = vrot.slane %v68_v19, 4  ;;  %v75_v26 = vsel %vm67_vm0, %v63_v4, 0.0  ;;  %s675_s26 = sld [smem:[#allocation4 + $0x6]]  ;;  %s681_s27 = sld [smem:[#allocation4 + $0xc]] }
  0x38   :  { %v142_v21 = vmax.f32 %v140_v11, %v141_v14  ;;  %v156_v25 = vmax.f32 %v154_v16, %v155_v18  ;;  %v82_v27 = vsel %vm67_vm0, %v59_v1, 0.0  ;;  %v89_v28 = vsel %vm67_vm0, %v64_v5, 0.0  ;;  %s684_s28 = sld [smem:[#allocation4 + $0xf]]  ;;  %s671_s29 = sld [smem:[#allocation4 + $0x2]] }
  0x39   :  { %v136_v29 = vrot.slane %v135_v20, 2  ;;  %v150_v31 = vrot.slane %v149_v22, 2  ;;  %v70_v32 = vadd.f32 %v69_v24, %v68_v19  ;;  %v76_v34 = vrot.slane %v75_v26, 4  ;;  %s680_s30 = sld [smem:[#allocation4 + $0xb]]  ;;  %s673_s4 = sld [smem:[#allocation4 + $0x4]] }
  0x3a   :  { %v143_v30 = vrot.slane %v142_v21, 2  ;;  %v157_v33 = vrot.slane %v156_v25, 2  ;;  %v83_v35 = vrot.slane %v82_v27, 4  ;;  %v90_v36 = vrot.slane %v89_v28, 4  ;;  %v132_v15 = vld [vmem:[#allocation3] sm:$0xf] }
  0x3b   :  { %v137_v37 = vmax.f32 %v135_v20, %v136_v29  ;;  %v151_v39 = vmax.f32 %v149_v22, %v150_v31  ;;  %v71_v40 = vrot.slane %v70_v32, 2  ;;  %v77_v42 = vadd.f32 %v76_v34, %v75_v26  ;;  %s235_s5 = sld [smem:[#allocation4]]  ;;  %s676_s0 = sld [smem:[#allocation4 + $0x7]] }
  0x3c   :  { %v144_v38 = vmax.f32 %v142_v21, %v143_v30  ;;  %v158_v41 = vmax.f32 %v156_v25, %v157_v33  ;;  %v84_v43 = vadd.f32 %v83_v35, %v82_v27  ;;  %v91_v44 = vadd.f32 %v90_v36, %v89_v28  ;;  %s814_s6 = smov 126   ;;  %s975_s7 = sld [smem:[#allocation4 + $0x9]] }
  0x3d   :  { %v138_v45 = vrot.slane %v137_v37, 1  ;;  %v152_v47 = vrot.slane %v151_v39, 1  ;;  %v72_v48 = vadd.f32 %v71_v40, %v70_v32  ;;  %v78_v50 = vrot.slane %v77_v42, 2  ;;  %s682_s8 = sld [smem:[#allocation4 + $0xd]]  ;;  %s685_s9 = sld [smem:[#allocation4 + $0x10]] }
  0x3e   :  { %v145_v46 = vrot.slane %v144_v38, 1  ;;  %v159_v49 = vrot.slane %v158_v41, 1  ;;  %v85_v51 = vrot.slane %v84_v43, 2  ;;  %v92_v52 = vrot.slane %v91_v44, 2  ;;  %v60_v23 = vld [vmem:[#allocation2] sm:$0xf] }
  0x3f   :  { %v139_v53 = vmax.f32 %v137_v37, %v138_v45  ;;  %v153_v55 = vmax.f32 %v151_v39, %v152_v47  ;;  %v73_v56 = vrot.slane %v72_v48, 1  ;;  %v79_v58 = vadd.f32 %v78_v50, %v77_v42  ;;  %s815_s10 = smov 1   ;;  %s670_s11 = sld [smem:[#allocation4 + $0x1]] }
  0x40   :  { %v146_v54 = vmax.f32 %v144_v38, %v145_v46  ;;  %v160_v57 = vmax.f32 %v158_v41, %v159_v49  ;;  %v86_v59 = vadd.f32 %v85_v51, %v84_v43  ;;  %v93_v60 = vadd.f32 %v92_v52, %v91_v44  ;;  %s679_s12 = sld [smem:[#allocation4 + $0xa]]  ;;  %s816_s13 = smov 127  }
  0x41   :  { %v74_v62 = vadd.f32 %v73_v56, %v72_v48  ;;  %v80_v0 = vrot.slane %v79_v58, 1  ;;  %vm121_vm1 = vcmask 1041409   ;;  %vm123_vm2 = vcmask 1043459   ;;  %s817_s14 = smov [#allocation11]  }
  0x42   :  { %v165_v61 = vcombine.low %v139_v53, %v146_v54  ;;  %v173_v63 = vcombine.low %v153_v55, %v160_v57  ;;  %v87_v1 = vrot.slane %v86_v59, 1  ;;  %v94_v2 = vrot.slane %v93_v60, 1  ;;  %s657_s15 = sshll.u32 %s817_s14, 4  ;;  %s658_s15 = int_to_ptr.vmem [resolvable:$true] %s657_s15 }
  0x43   :  { %v81_v5 = vadd.f32 %v80_v0, %v79_v58  ;;  %vm125_vm3 = vcmask 1045509   ;;  %vm127_vm4 = vcmask 1047559   ;;  %vm209_vm5 = vcmask 138240   ;;  %s773_s1 = scalar_lea.vmem %s658_s15, 64  ;;  %p778_p6 = scmp.lt.s32.totalorder %s658_s15, %s658_s15 }
  0x44   :  { %v172_v3 = vrot.slane %v165_v61, %v881_v17  ;;  %v180_v4 = vrot.slane %v173_v63, %v881_v17  ;;  %v88_v6 = vadd.f32 %v87_v1, %v86_v59  ;;  %v95_v7 = vadd.f32 %v94_v2, %v93_v60  ;;  %p774_p5 = scmp.ne.s32.totalorder %s658_s15, %s773_s1  ;;  %p779_p7 = scmp.lt.s32.totalorder %s773_s1, %s773_s1 }
  0x45   :  { %v100_v10 = vcombine.low %v74_v62, %v81_v5  ;;  %v366_v32 = vstv %s677_s19  ;;  %v301_v33 = vstv %s674_s20  ;;  %v516_v38 = vstv %s686_s21 }
  0x46   :  { %v183_v9 = vrot.slane %v180_v4, 7  ;;  %v108_v11 = vcombine.low %v88_v6, %v95_v7  ;;  %v452_v39 = vstv %s683_s22  ;;  %v258_v58 = vstv %s672_s25  ;;  %p780_p8 = por %p779_p7, %p778_p6 }
  0x47   :  { %v107_v13 = vrot.slane %v100_v10, %v881_v17  ;;  %v323_v59 = vstv %s675_s26  ;;  %v410_v62 = vstv %s681_s27  ;;  %v474_v63 = vstv %s684_s28 }
  0x48   :  { %v184_v12 = vsel %vm121_vm1, %v183_v9, %v172_v3  ;;  %v115_v14 = vrot.slane %v108_v11, %v881_v17  ;;  %vm271_vm6 = vcmask 916480   ;;  %vm336_vm7 = vcmask 785408   ;;  %p781_p9 = pnand %p780_p8, %p774_p5 }
  0x49   :  { %v185_v16 = vsel %vm123_vm2, %v183_v9, %v184_v12  ;;  %vm587_vm8 = vcmask 1031168   ;;  %vm559_vm9 = vcmask 7168   ;;  %vm647_vm10 = vcmask 1039360  }
  0x4a   :  { %v186_v18 = vsel %vm125_vm3, %v183_v9, %v185_v16  ;;  %v120_v19 = vrot.slane %v115_v14, 7 }
  0x4b   :  { %v187_v20 = vsel %vm127_vm4, %v183_v9, %v186_v18 }
  0x4c   :  { %v189_v21 = vmax.f32 %v132_v15, %v187_v20  ;;  %v122_v22 = vsel %vm121_vm1, %v120_v19, %v107_v13  ;;  %v250_v15 = vstv %s671_s29 }
  0x4d   :  { %v124_v24 = vsel %vm123_vm2, %v120_v19, %v122_v22 }
  0x4e   :  { %190 = vst [vmem:[#allocation3] sm:$0xf] %v189_v21  ;;  %v126_v25 = vsel %vm125_vm3, %v120_v19, %v124_v24 }
  0x4f   :  { %v128_v26 = vsel %vm127_vm4, %v120_v19, %v126_v25  ;;  %v402_v25 = vstv %s680_s30 }
  0x50   :  { %v130_v27 = vadd.f32 %v128_v26, %v60_v23 }
  0x52   :  { %131 = vst [vmem:[#allocation2] sm:$0xf] %v130_v27 }
  0x55   :  { %v669_v28 = vld.sshfl [vmem:[#allocation3] sm:$0x33 pattern:$0x76325410] }
  0x56   :  { %225 = vrot.lane.b32.xlu1 %v669_v28, %s811_s2  ;;  %v224_v29 = vcombine.high %v669_v28, %v669_v28 }
  0x59   :  { %v668_v30 = vld.sshfl [vmem:[#allocation2] sm:$0x33 pattern:$0x76325410] }
  0x5a   :  { %205 = vrot.lane.b32.xlu0 %v668_v30, %s811_s2  ;;  %v204_v31 = vcombine.high %v668_v30, %v668_v30  ;;  %227 = vrot.lane.b32.xlu1 %v224_v29, %s811_s2 }
  0x5e   :  { %207 = vrot.lane.b32.xlu0 %v204_v31, %s811_s2 }
  0xc8   :  { %v226_v34 = vpop.permute.xlu1 %225 }
  0xc9   :  { %v896_v36 = vsel %vm209_vm5, 0.0, %v226_v34 }
  0xca   :  { %v517_v43 = vmul.f32 %v516_v38, %v896_v36  ;;  %v453_v44 = vmul.f32 %v452_v39, %v896_v36  ;;  %v411_v0 = vmul.f32 %v410_v62, %v896_v36  ;;  %v475_v1 = vmul.f32 %v474_v63, %v896_v36 }
  0xcc   :  { %v206_v35 = vpop.permute.xlu0 %205  ;;  %v228_v49 = vpop.permute.xlu1 %227 }
  0xcd   :  { %v899_v37 = vsel %vm209_vm5, 0.0, %v206_v35  ;;  %v920_v50 = vsel %vm209_vm5, %v228_v49, 0.0  ;;  %v925_v53 = vsel %vm209_vm5, %v226_v34, %v228_v49 }
  0xce   :  { %v367_v40 = vmul.f32 %v366_v32, %v899_v37  ;;  %v302_v41 = vmul.f32 %v301_v33, %v899_v37  ;;  %v455_v54 = vmul.f32 %v452_v39, %v920_v50  ;;  %v454_v55 = vmul.f32 %v452_v39, %v925_v53 }
  0xcf   :  { %v518_v56 = vmul.f32 %v516_v38, %v925_v53  ;;  %v519_v57 = vmul.f32 %v516_v38, %v920_v50  ;;  %v259_v60 = vmul.f32 %v258_v58, %v899_v37  ;;  %v324_v61 = vmul.f32 %v323_v59, %v899_v37 }
  0xd0   :  { %373 = vrot.lane.b32.xlu1 %v367_v40, %s812_s23  ;;  %308 = vrot.lane.b32.xlu0 %v302_v41, %s813_s24  ;;  %v208_v42 = vpop.permute.xlu0 %207  ;;  %v413_v6 = vmul.f32 %v410_v62, %v920_v50  ;;  %v412_v7 = vmul.f32 %v410_v62, %v925_v53  ;;  %v476_v9 = vmul.f32 %v474_v63, %v925_v53 }
  0xd1   :  { %v908_v45 = vsel %vm209_vm5, %v208_v42, 0.0  ;;  %v911_v46 = vsel %vm209_vm5, %v206_v35, %v208_v42  ;;  %v477_v10 = vmul.f32 %v474_v63, %v920_v50  ;;  %v251_v22 = vmul.f32 %v250_v15, %v899_v37 }
  0xd2   :  { %v304_v47 = vmul.f32 %v301_v33, %v908_v45  ;;  %v303_v48 = vmul.f32 %v301_v33, %v911_v46  ;;  %v368_v51 = vmul.f32 %v366_v32, %v911_v46  ;;  %v369_v52 = vmul.f32 %v366_v32, %v908_v45 }
  0xd3   :  { %v261_v2 = vmul.f32 %v258_v58, %v908_v45  ;;  %v260_v3 = vmul.f32 %v258_v58, %v911_v46  ;;  %v325_v4 = vmul.f32 %v323_v59, %v911_v46  ;;  %v326_v5 = vmul.f32 %v323_v59, %v908_v45 }
  0xd4   :  { %523 = vrot.lane.b32.xlu1 %v517_v43, %s812_s23  ;;  %459 = vrot.lane.b32.xlu0 %v453_v44, %s813_s24  ;;  %v253_v20 = vmul.f32 %v250_v15, %v908_v45  ;;  %v252_v23 = vmul.f32 %v250_v15, %v911_v46  ;;  %v405_v33 = vmul.f32 %v402_v25, %v920_v50  ;;  %v279_v59 = vstv %s673_s4 }
  0xd5   :  { %v403_v38 = vmul.f32 %v402_v25, %v896_v36  ;;  %v404_v39 = vmul.f32 %v402_v25, %v925_v53 }
  0xd8   :  { %312 = vrot.lane.b32.xlu0 %v304_v47, %s813_s24  ;;  %310 = vrot.lane.b32.xlu1 %v303_v48, %s813_s24 }
  0xdc   :  { %375 = vrot.lane.b32.xlu0 %v368_v51, %s812_s23  ;;  %377 = vrot.lane.b32.xlu1 %v369_v52, %s812_s23 }
  0xe0   :  { %463 = vrot.lane.b32.xlu0 %v455_v54, %s813_s24  ;;  %461 = vrot.lane.b32.xlu1 %v454_v55, %s813_s24 }
  0xe4   :  { %525 = vrot.lane.b32.xlu0 %v518_v56, %s812_s23  ;;  %527 = vrot.lane.b32.xlu1 %v519_v57, %s812_s23 }
  0xe8   :  { %265 = vrot.lane.b32.xlu0 %v259_v60, %s813_s24  ;;  %330 = vrot.lane.b32.xlu1 %v324_v61, %s812_s23 }
  0xec   :  { %417 = vrot.lane.b32.xlu0 %v411_v0, %s813_s24  ;;  %481 = vrot.lane.b32.xlu1 %v475_v1, %s812_s23  ;;  %v280_v0 = vmul.f32 %v279_v59, %v899_v37 }
  0xf0   :  { %269 = vrot.lane.b32.xlu0 %v261_v2, %s813_s24  ;;  %267 = vrot.lane.b32.xlu1 %v260_v3, %s813_s24  ;;  %v282_v3 = vmul.f32 %v279_v59, %v908_v45 }
  0xf4   :  { %332 = vrot.lane.b32.xlu0 %v325_v4, %s812_s23  ;;  %334 = vrot.lane.b32.xlu1 %v326_v5, %s812_s23  ;;  %v281_v4 = vmul.f32 %v279_v59, %v911_v46  ;;  %v236_v5 = vstv %s235_s5 }
  0xf5   :  { %v238_v15 = vmul.f32 %v236_v5, %v911_v46 }
  0xf8   :  { %421 = vrot.lane.b32.xlu0 %v413_v6, %s813_s24  ;;  %419 = vrot.lane.b32.xlu1 %v412_v7, %s813_s24  ;;  %v344_v6 = vstv %s676_s0 }
  0xfc   :  { %483 = vrot.lane.b32.xlu0 %v476_v9, %s812_s23  ;;  %485 = vrot.lane.b32.xlu1 %v477_v10, %s812_s23 }
 0x142   :  { %v374_v11 = vpop.permute.xlu1 %373  ;;  %v309_v12 = vpop.permute.xlu0 %308 }
 0x146   :  { %v524_v13 = vpop.permute.xlu1 %523  ;;  %v460_v14 = vpop.permute.xlu0 %459 }
 0x14a   :  { %v311_v16 = vpop.permute.xlu1 %310  ;;  %v313_v18 = vpop.permute.xlu0 %312 }
 0x14b   :  { %v314_v19 = vsel %vm271_vm6, %v309_v12, %v311_v16  ;;  %v315_v21 = vsel %vm271_vm6, %v311_v16, %v313_v18  ;;  %v321_v24 = vadd.f32 %v313_v18, %v253_v20  ;;  %v388_v12 = vstv %s975_s7 }
 0x14c   :  { %v319_v26 = vadd.f32 %v314_v19, %v251_v22  ;;  %v320_v27 = vadd.f32 %v315_v21, %v252_v23  ;;  %v346_v16 = vmul.f32 %v344_v6, %v911_v46  ;;  %v345_v18 = vmul.f32 %v344_v6, %v899_v37 }
 0x14d   :  { %v389_v25 = vmul.f32 %v388_v12, %v896_v36 }
 0x14e   :  { %v378_v28 = vpop.permute.xlu1 %377  ;;  %v376_v29 = vpop.permute.xlu0 %375 }
 0x14f   :  { %v386_v30 = vadd.f32 %v378_v28, %v321_v24  ;;  %v379_v31 = vsel %vm336_vm7, %v374_v11, %v376_v29  ;;  %v380_v32 = vsel %vm336_vm7, %v376_v29, %v378_v28  ;;  %v347_v29 = vmul.f32 %v344_v6, %v908_v45 }
 0x150   :  { %v384_v34 = vadd.f32 %v379_v31, %v319_v26  ;;  %v385_v35 = vadd.f32 %v380_v32, %v320_v27 }
 0x151   :  { %v408_v40 = vadd.f32 %v405_v33, %v386_v30  ;;  %v390_v30 = vmul.f32 %v388_v12, %v925_v53 }
 0x152   :  { %v462_v41 = vpop.permute.xlu1 %461  ;;  %v406_v42 = vadd.f32 %v403_v38, %v384_v34  ;;  %v407_v43 = vadd.f32 %v404_v39, %v385_v35  ;;  %v464_v44 = vpop.permute.xlu0 %463 }
 0x153   :  { %v465_v47 = vsel %vm271_vm6, %v460_v14, %v462_v41  ;;  %v466_v48 = vsel %vm271_vm6, %v462_v41, %v464_v44  ;;  %v472_v60 = vadd.f32 %v464_v44, %v408_v40  ;;  %v237_v14 = vmul.f32 %v236_v5, %v899_v37 }
 0x154   :  { %v470_v49 = vadd.f32 %v465_v47, %v406_v42  ;;  %v471_v51 = vadd.f32 %v466_v48, %v407_v43  ;;  %v494_v40 = vstv %s685_s9  ;;  %v543_v41 = vsub.s32 0, %v874_v8  ;;  %v537_v42 = vld [vmem:[#allocation8] ss:$2 sm:$0x3] }
 0x156   :  { %v528_v52 = vpop.permute.xlu1 %527  ;;  %v526_v54 = vpop.permute.xlu0 %525 }
 0x157   :  { %v529_v55 = vsel %vm336_vm7, %v524_v13, %v526_v54  ;;  %v530_v56 = vsel %vm336_vm7, %v526_v54, %v528_v52  ;;  %v536_v63 = vadd.f32 %v528_v52, %v472_v60  ;;  %v430_v13 = vstv %s682_s8 }
 0x158   :  { %v534_v57 = vadd.f32 %v529_v55, %v470_v49  ;;  %v535_v58 = vadd.f32 %v530_v56, %v471_v51  ;;  %v431_v26 = vmul.f32 %v430_v13, %v896_v36  ;;  %v433_v38 = vmul.f32 %v430_v13, %v920_v50 }
 0x159   :  { %v432_v39 = vmul.f32 %v430_v13, %v925_v53  ;;  %v495_v51 = vmul.f32 %v494_v40, %v896_v36  ;;  %v496_v54 = vmul.f32 %v494_v40, %v925_v53  ;;  %v544_v55 = vrot.slane %v537_v42, %v543_v41 }
 0x15a   :  { %v331_v61 = vpop.permute.xlu1 %330  ;;  %583 = vrot.lane.b32.xlu1 %v535_v58, %s814_s6  ;;  %581 = vrot.lane.b32.xlu0 %v534_v57, %s814_s6  ;;  %v266_v62 = vpop.permute.xlu0 %265  ;;  %v547_v56 = vsub.s32 1, %v874_v8  ;;  %v497_v60 = vmul.f32 %v494_v40, %v920_v50 }
 0x15e   :  { %v482_v1 = vpop.permute.xlu1 %481  ;;  %286 = vrot.lane.b32.xlu1 %v280_v0, %s813_s24  ;;  %585 = vrot.lane.b32.xlu0 %v536_v63, %s814_s6  ;;  %v418_v2 = vpop.permute.xlu0 %417  ;;  %v539_v0 = vld [vmem:[#allocation8 + $0x1] ss:$2 sm:$0x3] }
 0x15f   :  { %v571_v8 = vrot.slane %v539_v0, %v543_v41  ;;  %v575_v5 = vrot.slane %v539_v0, %v547_v56 }
 0x162   :  { %v268_v7 = vpop.permute.xlu1 %267  ;;  %290 = vrot.lane.b32.xlu1 %v282_v3, %s813_s24  ;;  %288 = vrot.lane.b32.xlu0 %v281_v4, %s813_s24  ;;  %v270_v9 = vpop.permute.xlu0 %269 }
 0x163   :  { %v272_v10 = vsel %vm271_vm6, %v266_v62, %v268_v7  ;;  %v273_v11 = vsel %vm271_vm6, %v268_v7, %v270_v9  ;;  %v548_v62 = vrot.slane %v537_v42, %v547_v56 }
 0x164   :  { %v276_v19 = vadd.f32 %v272_v10, %v237_v14  ;;  %v277_v20 = vadd.f32 %v273_v11, %v238_v15  ;;  %v242_v11 = vstv %s670_s11 }
 0x165   :  { %v243_v15 = vmul.f32 %v242_v11, %v899_v37 }
 0x166   :  { %v335_v21 = vpop.permute.xlu1 %334  ;;  %353 = vrot.lane.b32.xlu1 %v346_v16, %s812_s23  ;;  %351 = vrot.lane.b32.xlu0 %v345_v18, %s812_s23  ;;  %v333_v22 = vpop.permute.xlu0 %332  ;;  %v394_v16 = vstv %s679_s12 }
 0x167   :  { %v337_v23 = vsel %vm336_vm7, %v331_v61, %v333_v22  ;;  %v338_v24 = vsel %vm336_vm7, %v333_v22, %v335_v21  ;;  %v245_v21 = vmul.f32 %v242_v11, %v908_v45  ;;  %v396_v45 = vmul.f32 %v394_v16, %v925_v53 }
 0x168   :  { %v341_v27 = vadd.f32 %v337_v23, %v276_v19  ;;  %v342_v28 = vadd.f32 %v338_v24, %v277_v20  ;;  %v244_v24 = vmul.f32 %v242_v11, %v911_v46 }
 0x16a   :  { %v420_v31 = vpop.permute.xlu1 %419  ;;  %v391_v32 = vadd.f32 %v389_v25, %v341_v27  ;;  %437 = vrot.lane.b32.xlu1 %v431_v26, %s813_s24  ;;  %355 = vrot.lane.b32.xlu0 %v347_v29, %s812_s23  ;;  %v392_v33 = vadd.f32 %v390_v30, %v342_v28  ;;  %v422_v34 = vpop.permute.xlu0 %421  ;;  %v395_v26 = vmul.f32 %v394_v16, %v896_v36 }
 0x16b   :  { %v423_v35 = vsel %vm271_vm6, %v418_v2, %v420_v31  ;;  %v424_v48 = vsel %vm271_vm6, %v420_v31, %v422_v34 }
 0x16c   :  { %v427_v43 = vadd.f32 %v423_v35, %v391_v32  ;;  %v428_v58 = vadd.f32 %v424_v48, %v392_v33  ;;  %v397_v32 = vmul.f32 %v394_v16, %v920_v50 }
 0x16e   :  { %v486_v44 = vpop.permute.xlu1 %485  ;;  %441 = vrot.lane.b32.xlu1 %v433_v38, %s813_s24  ;;  %439 = vrot.lane.b32.xlu0 %v432_v39, %s813_s24  ;;  %v484_v47 = vpop.permute.xlu0 %483 }
 0x16f   :  { %v487_v49 = vsel %vm336_vm7, %v482_v1, %v484_v47  ;;  %v488_v57 = vsel %vm336_vm7, %v484_v47, %v486_v44 }
 0x170   :  { %v491_v52 = vadd.f32 %v487_v49, %v427_v43  ;;  %v492_v59 = vadd.f32 %v488_v57, %v428_v58 }
 0x172   :  { %503 = vrot.lane.b32.xlu1 %v496_v54, %s812_s23  ;;  %501 = vrot.lane.b32.xlu0 %v495_v51, %s812_s23  ;;  %v551_v61 = vmul.f32 %v544_v55, %v491_v52  ;;  %v552_v63 = vmul.f32 %v548_v62, %v492_v59 }
 0x176   :  { %505 = vrot.lane.b32.xlu0 %v497_v60, %s812_s23  ;;  %555 = vrot.lane.b32.xlu1 %v551_v61, %s815_s10 }
 0x17a   :  { %557 = vrot.lane.b32.xlu0 %v552_v63, %s815_s10 }
 0x1cc   :  { %v584_v1 = vpop.permute.xlu1 %583  ;;  %v582_v2 = vpop.permute.xlu0 %581 }
 0x1cd   :  { %v588_v3 = vsel %vm587_vm8, %v582_v2, %v584_v1 }
 0x1ce   :  { %v592_v4 = vmul.f32 %v588_v3, %v571_v8 }
 0x1d0   :  { %v287_v6 = vpop.permute.xlu1 %286  ;;  %596 = vrot.lane.b32.xlu1 %v592_v4, %s815_s10  ;;  %v586_v7 = vpop.permute.xlu0 %585 }
 0x1d1   :  { %v589_v9 = vsel %vm587_vm8, %v584_v1, %v586_v7 }
 0x1d2   :  { %v593_v10 = vmul.f32 %v589_v9, %v575_v5 }
 0x1d4   :  { %v291_v12 = vpop.permute.xlu1 %290  ;;  %598 = vrot.lane.b32.xlu0 %v593_v10, %s815_s10  ;;  %v289_v13 = vpop.permute.xlu0 %288 }
 0x1d5   :  { %v292_v14 = vsel %vm271_vm6, %v287_v6, %v289_v13  ;;  %v293_v22 = vsel %vm271_vm6, %v289_v13, %v291_v12  ;;  %v299_v27 = vadd.f32 %v291_v12, %v245_v21 }
 0x1d6   :  { %v297_v18 = vadd.f32 %v292_v14, %v243_v15  ;;  %v298_v28 = vadd.f32 %v293_v22, %v244_v24 }
 0x1d8   :  { %v354_v19 = vpop.permute.xlu1 %353  ;;  %v352_v20 = vpop.permute.xlu0 %351 }
 0x1d9   :  { %v357_v23 = vsel %vm336_vm7, %v352_v20, %v354_v19 }
 0x1da   :  { %v362_v25 = vadd.f32 %v357_v23, %v297_v18 }
 0x1dc   :  { %v356_v29 = vpop.permute.xlu0 %355  ;;  %v398_v30 = vadd.f32 %v395_v26, %v362_v25  ;;  %v438_v38 = vpop.permute.xlu1 %437 }
 0x1dd   :  { %v358_v37 = vsel %vm336_vm7, %v354_v19, %v356_v29  ;;  %v364_v31 = vadd.f32 %v356_v29, %v299_v27 }
 0x1de   :  { %v363_v33 = vadd.f32 %v358_v37, %v298_v28 }
 0x1df   :  { %v400_v34 = vadd.f32 %v397_v32, %v364_v31 }
 0x1e0   :  { %v399_v35 = vadd.f32 %v396_v45, %v363_v33  ;;  %v440_v39 = vpop.permute.xlu0 %439  ;;  %v442_v46 = vpop.permute.xlu1 %441 }
 0x1e1   :  { %v443_v36 = vsel %vm271_vm6, %v438_v38, %v440_v39  ;;  %v444_v50 = vsel %vm271_vm6, %v440_v39, %v442_v46  ;;  %v450_v53 = vadd.f32 %v442_v46, %v400_v34 }
 0x1e2   :  { %v448_v44 = vadd.f32 %v443_v36, %v398_v30  ;;  %v449_v54 = vadd.f32 %v444_v50, %v399_v35 }
 0x1e4   :  { %v502_v40 = vpop.permute.xlu0 %501  ;;  %v504_v41 = vpop.permute.xlu1 %503 }
 0x1e5   :  { %v507_v42 = vsel %vm336_vm7, %v502_v40, %v504_v41 }
 0x1e6   :  { %v512_v47 = vadd.f32 %v507_v42, %v448_v44 }
 0x1e8   :  { %v506_v43 = vpop.permute.xlu0 %505  ;;  %v556_v48 = vpop.permute.xlu1 %555 }
 0x1e9   :  { %v564_v51 = vadd.f32 %v556_v48, %v512_v47  ;;  %v508_v52 = vsel %vm336_vm7, %v504_v41, %v506_v43  ;;  %v514_v56 = vadd.f32 %v506_v43, %v450_v53 }
 0x1ea   :  { %v513_v59 = vadd.f32 %v508_v52, %v449_v54 }
 0x1ec   :  { %v558_v49 = vpop.permute.xlu0 %557 }
 0x1ed   :  { %v560_v57 = vsel %vm559_vm9, %v556_v48, %v558_v49  ;;  %v566_v60 = vadd.f32 %v558_v49, %v514_v56 }
 0x1ee   :  { %v565_v62 = vadd.f32 %v560_v57, %v513_v59 }
 0x242   :  { %v597_v55 = vpop.permute.xlu1 %596 }
 0x243   :  { %v604_v58 = vadd.f32 %v597_v55, %v564_v51 }
 0x245   :  { %v687_v61 = vmul.f32 -1.442695, %v604_v58 }
 0x246   :  { %v599_v63 = vpop.permute.xlu0 %598 }
 0x247   :  { %707 = vpow2.f32 %v687_v61  ;;  %v600_v0 = vsel %vm559_vm9, %v597_v55, %v599_v63  ;;  %v606_v8 = vadd.f32 %v599_v63, %v566_v60 }
 0x248   :  { %v605_v1 = vadd.f32 %v600_v0, %v565_v62 }
 0x249   :  { %v689_v2 = vmul.f32 -1.442695, %v606_v8 }
 0x24a   :  { %v688_v3 = vmul.f32 -1.442695, %v605_v1 }
 0x24b   :  { %709 = vpow2.f32 %v689_v2 }
 0x24c   :  { %711 = vpow2.f32 %v688_v3 }
 0x251   :  { %v708_v4 = vpop.eup %707 }
 0x252   :  { %v616_v5 = vadd.f32 1.0, %v708_v4 }
 0x254   :  { %713 = vrcp.f32 %v616_v5 }
 0x255   :  { %v710_v6 = vpop.eup %709 }
 0x256   :  { %v712_v7 = vpop.eup %711  ;;  %v618_v9 = vadd.f32 1.0, %v710_v6 }
 0x257   :  { %v617_v10 = vadd.f32 1.0, %v712_v7 }
 0x258   :  { %715 = vrcp.f32 %v618_v9 }
 0x259   :  { %717 = vrcp.f32 %v617_v10 }
 0x25e   :  { %v714_v11 = vpop.eup %713 }
 0x262   :  { %v716_v12 = vpop.eup %715 }
 0x263   :  { %v718_v13 = vpop.eup %717  ;;  %v642_v16 = vrot.slane %v716_v12, %v881_v17 }
 0x264   :  { %v628_v14 = vcombine.low %v714_v11, %v718_v13 }
 0x266   :  { %v635_v15 = vrot.slane %v628_v14, %v881_v17 }
 0x268   :  { %v643_v18 = vcombine.low %v635_v15, %v642_v16 }
 0x26a   :  { %644 = vrot.lane.b32.xlu1 %v643_v18, %s816_s13 }
 0x2dc   :  { %v645_v19 = vpop.permute.xlu1 %644 }
 0x2dd   :  { %v646_v20 = vrot.slane %v645_v19, 2 }
 0x2df   :  { %v648_v21 = vsel %vm647_vm10, %v645_v19, %v646_v20 }
 0x2e0   :  { %650 = vst [vmem:[#allocation11] sm:$0xf] %v648_v21 }
 0x2e1   :  { %784 = shalt.err (!%p781_p9)
}
 0x2e2   :  { %s785_s18 = scalar_lea.hbm %s1049_s3, 64 }
 0x2e3   :  { %p786_p10 = scmp.ne.s32.totalorder %s1049_s3, %s785_s18  ;;  %p789_p11 = scmp.lt.u32.totalorder %s785_s18, %s1049_s3 }
 0x2e5   :  { %p791_p12 = pnand %p789_p11, %p786_p10 }
 0x2e7   :  { %794 = shalt.err (!%p791_p12)
}
 0x2e8   :  { %660 = dma.vmem_to_hbm [thread:$0]  %s658_s15, 64, %s1049_s3, [#allocation6]  }
 0x2e9   :  { %801 = dma.done.wait [#allocation6], 64  }
 0x2ea   :  { %802 = vsyncadd [#allocation6], 4294967232 }
 0x2eb   :  { %664 = vsyncpa [#allocation5], 1 }
 0x2ec   :  { %665 = vsyncpa [#allocation10], 1 }
 0x2ed   :  { %666 = vsyncpa [#allocation6], 1 }
 0x2ee   :  { %667 = vsyncpa [#allocation7], 1 }

</bundles_post_ra>
